<compile_context>
chip_gen: v7x
topology: tpu7x:2x2x1
jax: 0.10.0
libtpu: 0.0.40
codegen_flags: <defaults>
</compile_context>

<pallas_src>
import jax
import jax.numpy as jnp
from jax.experimental import pallas as pl
from jax.experimental.pallas import tpu as pltpu


def _broadcast_rows_kernel(x_last_ref, o_ref):
    # x_last_ref: (1, F) VMEM tile holding x[L-1] flattened (constant, read-once).
    # o_ref:      (To, F) VMEM tile of To output rows; every row is x[L-1].
    o_ref[...] = jnp.broadcast_to(x_last_ref[...], o_ref.shape)


def fx_last(x, output_len: int, *, vmem_tile_bytes: int = 4 * 1024 * 1024):
    """Pallas equivalent of FXLast.forward.

    x: (L, N, D). Returns (output_len, N, D) where every row equals x[L-1].
    """
    L, N, D = x.shape
    F = N * D

    if output_len == 0:
        return jnp.zeros((0, N, D), dtype=x.dtype)

    # Read-once operand: pre-slice the last timestep and flatten so the output
    # can be streamed as a lane-dense (output_len, N*D) 2-D slab.
    x_last = x[L - 1].reshape(1, F)

    # Row blocking: write as many output rows per grid step as fit the VMEM
    # tile budget (double-buffered output + tiny resident input stays well
    # under the 32 MiB scoped default on all chips, including v7x).
    itemsize = jnp.dtype(x.dtype).itemsize
    row_bytes = max(1, F * itemsize)
    rows_fit = max(1, vmem_tile_bytes // row_bytes)
    if rows_fit >= output_len:
        block_rows = output_len          # whole output in a single block
    else:
        block_rows = max(8, (rows_fit // 8) * 8)   # keep sublane alignment
    block_rows = min(block_rows, output_len)

    grid = (pl.cdiv(output_len, block_rows),)

    out2d = pl.pallas_call(
        _broadcast_rows_kernel,
        out_shape=jax.ShapeDtypeStruct((output_len, F), x.dtype),
        grid_spec=pltpu.PrefetchScalarGridSpec(
            num_scalar_prefetch=0,
            grid=grid,
            in_specs=[
                # Constant index map: the single (1, F) input block is the full
                # input array and stays resident across all grid steps.
                pl.BlockSpec((1, F), lambda i: (0, 0)),
            ],
            out_specs=pl.BlockSpec((block_rows, F), lambda i: (i, 0)),
        ),
        compiler_params=pltpu.CompilerParams(
            # Output blocks are independent -> megacore sharding on v7x,
            # no-op on single-TC v5e/v6e.
            dimension_semantics=("parallel",),
        ),
    )(x_last)

    return out2d.reshape(output_len, N, D)


if __name__ == "__main__":
    # Shapes consistent with the module: L=8 (seq), N=2 (batch), D=32 (dim).
    L, N, D = 8, 2, 32
    output_len = 4

    key = jax.random.PRNGKey(0)
    x = jax.random.normal(key, (L, N, D), dtype=jnp.float32)

    y = fx_last(x, output_len)
    y = jax.block_until_ready(y)

    ref = jnp.broadcast_to(x[L - 1][None, :, :], (output_len, N, D))
    assert y.shape == (output_len, N, D)
    assert jnp.array_equal(y, ref)

    # Also exercise the multi-block path (2 grid steps of 8 rows each).
    output_len2 = 16
    y2 = fx_last(x, output_len2, vmem_tile_bytes=2048)
    y2 = jax.block_until_ready(y2)
    ref2 = jnp.broadcast_to(x[L - 1][None, :, :], (output_len2, N, D))
    assert jnp.array_equal(y2, ref2)

    print("KERNEL_OK")
</pallas_src>

<mosaic_0001>
module attributes {stable_mosaic.version = 11 : i64} {
  func.func @_broadcast_rows_kernel(%arg0: i32, %arg1: memref<1x64xf32, #tpu.memory_space<vmem>>, %arg2: memref<4x64xf32, #tpu.memory_space<vmem>>) attributes {dimension_semantics = [#tpu.dimension_semantics<parallel>], iteration_bounds = array<i64: 1>, scalar_prefetch = 0 : i64, scratch_operands = 0 : i64, tpu.core_type = #tpu.core_type<tc>, window_params = [{pipeline_mode = #tpu.pipeline_mode<synchronous>, transform_indices = @transform_0, window_bounds = array<i64: 1, 64>}, {transform_indices = @transform_1, window_bounds = array<i64: 4, 64>}]} {
    %c0 = arith.constant 0 : index
    %c0_0 = arith.constant 0 : index
    %0 = vector.load %arg1[%c0, %c0_0] : memref<1x64xf32, #tpu.memory_space<vmem>>, vector<1x64xf32>
    %1 = vector.shape_cast %0 : vector<1x64xf32> to vector<1x64xf32>
    %2 = vector.broadcast %1 : vector<1x64xf32> to vector<4x64xf32>
    %c0_1 = arith.constant 0 : index
    %c0_2 = arith.constant 0 : index
    %3 = vector.load %arg2[%c0_1, %c0_2] : memref<4x64xf32, #tpu.memory_space<vmem>>, vector<4x64xf32>
    tpu.vector_store %arg2[%c0_1, %c0_2], %2 {strides = array<i32>} : memref<4x64xf32, #tpu.memory_space<vmem>>, vector<4x64xf32>,
    return
  }
  func.func @transform_0(%arg0: i32) -> (i32, i32) {
    %c0_i32 = arith.constant 0 : i32
    %c0_i32_0 = arith.constant 0 : i32
    %c0_i32_1 = arith.constant 0 : i32
    return %c0_i32, %c0_i32_0 : i32, i32
  }
  func.func @transform_1(%arg0: i32) -> (i32, i32) {
    %c0_i32 = arith.constant 0 : i32
    %c0_i32_0 = arith.constant 0 : i32
    return %arg0, %c0_i32 : i32, i32
  }
}

</mosaic_0001>

<bundles_post_ra>
// kernel: tpu_custom_call.1
= control target key start
LH: loop header
LB: loop body
LE: loop exit
PB: predicated region body
PF: predicated region fallthrough
CT: control target
= control target key end

     0   :  { %6 = vsyncpa [#allocation3], 0  ;;  %s132_s0 = inlined_call_operand.hbm [shape: f32[1,64], index: 0, kind: input, shape index: {}]   ;;  %s133_s1 = inlined_call_operand.hbm [shape: f32[4,64], index: 1, kind: output, shape index: {}]  }
   0x1   :  { %7 = vsyncpa [#allocation4], 0  ;;  %s96_s6 = smov [#allocation2]   ;;  %s48_s10 = scalar_lea.hbm %s132_s0, 16 }
   0x2   :  { %s14_s7 = sshll.u32 %s96_s6, 4  ;;  %p49_p0 = scmp.ne.s32.totalorder %s132_s0, %s48_s10  ;;  %s15_s7 = int_to_ptr.vmem [resolvable:$true] %s14_s7 }
   0x3   :  { %p52_p1 = scmp.lt.u32.totalorder %s48_s10, %s132_s0 }
   0x5   :  { %p54_p2 = pnand %p52_p1, %p49_p0 }
   0x7   :  { %57 = shalt.err (!%p54_p2)
}
   0x8   :  { %s58_s15 = scalar_lea.vmem %s15_s7, 16  ;;  %s62_s16 = scalar_lea.vmem %s15_s7, 32 }
   0x9   :  { %p59_p3 = scmp.ne.s32.totalorder %s15_s7, %s58_s15  ;;  %p63_p4 = scmp.lt.s32.totalorder %s15_s7, %s15_s7 }
   0xa   :  { %p64_p5 = scmp.lt.s32.totalorder %s62_s16, %s58_s15 }
   0xc   :  { %p65_p6 = por %p64_p5, %p63_p4 }
   0xe   :  { %p66_p7 = pnand %p65_p6, %p59_p3 }
  0x10   :  { %69 = shalt.err (!%p66_p7)
}
  0x11   :  { %17 = dma.hbm_to_vmem [thread:$0]  %s132_s0, 16, %s15_s7, [#allocation3]  }
  0x12   :  { %92 = dma.done.wait [#allocation3], 16  }
  0x13   :  { %93 = vsyncadd [#allocation3], 4294967280  ;;  %s97_s19 = smov [#allocation5]   ;;  %vm28_vm0 = vcmask 519168   ;;  %v45_v0 = vld [vmem:[#allocation2] ss:$0 sm:$0xff] }
  0x14   :  { %s36_s20 = sshll.u32 %s97_s19, 4  ;;  %29 = vst.msk [vmem:[#allocation5] sm:$0xf] %vm28_vm0, %v45_v0  ;;  %s37_s20 = int_to_ptr.vmem [resolvable:$true] %s36_s20 }
  0x15   :  { %s70_s21 = scalar_lea.vmem %s37_s20, 64  ;;  %p75_p9 = scmp.lt.s32.totalorder %s37_s20, %s37_s20 }
  0x16   :  { %p71_p8 = scmp.ne.s32.totalorder %s37_s20, %s70_s21  ;;  %p76_p10 = scmp.lt.s32.totalorder %s70_s21, %s70_s21 }
  0x18   :  { %p77_p11 = por %p76_p10, %p75_p9 }
  0x1a   :  { %p78_p12 = pnand %p77_p11, %p71_p8 }
  0x1c   :  { %81 = shalt.err (!%p78_p12)
}
  0x1d   :  { %s82_s24 = scalar_lea.hbm %s133_s1, 64 }
  0x1e   :  { %p83_p13 = scmp.ne.s32.totalorder %s133_s1, %s82_s24  ;;  %p86_p0 = scmp.lt.u32.totalorder %s82_s24, %s133_s1 }
  0x20   :  { %p88_p1 = pnand %p86_p0, %p83_p13 }
  0x22   :  { %91 = shalt.err (!%p88_p1)
}
  0x23   :  { %39 = dma.vmem_to_hbm [thread:$0]  %s37_s20, 64, %s133_s1, [#allocation4]  }
  0x24   :  { %94 = dma.done.wait [#allocation4], 64  }
  0x25   :  { %95 = vsyncadd [#allocation4], 4294967232 }
  0x26   :  { %43 = vsyncpa [#allocation3], 1 }
  0x27   :  { %44 = vsyncpa [#allocation4], 1 }

</bundles_post_ra>
